<compile_context>
chip_gen: v6e
topology: v6e:2x2x1
jax: 0.10.0
libtpu: 0.0.40
codegen_flags: <defaults>
</compile_context>

<pallas_src>
import jax
import jax.numpy as jnp
from jax.experimental import pallas as pl
from jax.experimental.pallas import tpu as pltpu

_LANE = 128          # lane width (last-dim tiling)
_SUBLANE = 8         # f32 sublane count (second-to-last-dim tiling)
_PREFERRED_TILE = 512  # rows per grid step; sweep 256/512/1024 if tuning further


def _round_up(n, m):
    return ((n + m - 1) // m) * m


def _fused_mlp_kernel(x_ref, w1_ref, b1_ref, w2_ref, b2_ref,
                      w3_ref, b3_ref, w4_ref, b4_ref, o_ref):
    """Whole 4-layer MLP for one batch tile.

    4x MXU matmuls (bf16 operands, f32 accumulate) with f32 bias+ReLU
    epilogues on the VPU.  The f32->bf16 cast of x rides in the VPU slot
    (kernel is DMA-bound).  Intermediates stay in VMEM/vregs; only the final
    lane-dense (padded) logits block is written out.
    """
    h = jnp.dot(x_ref[...].astype(jnp.bfloat16), w1_ref[...],
                preferred_element_type=jnp.float32)
    h = jnp.maximum(h + b1_ref[...], 0.0)

    h = jnp.dot(h.astype(jnp.bfloat16), w2_ref[...],
                preferred_element_type=jnp.float32)
    h = jnp.maximum(h + b2_ref[...], 0.0)

    h = jnp.dot(h.astype(jnp.bfloat16), w3_ref[...],
                preferred_element_type=jnp.float32)
    h = jnp.maximum(h + b3_ref[...], 0.0)

    h = jnp.dot(h.astype(jnp.bfloat16), w4_ref[...],
                preferred_element_type=jnp.float32)
    o_ref[...] = (h + b4_ref[...]).astype(o_ref.dtype)


def fused_mlp(x_pad, params, *, batch_tile):
    """x_pad: (B_pad, Kp) f32 with Kp % 128 == 0 and B_pad % batch_tile == 0.

    params: list of 4 (w_padded_bf16 (Kp_i, Np_i), b_padded_f32 (1, Np_i)).
    Returns padded logits (B_pad, Np_last) f32.
    """
    B_pad, Kp = x_pad.shape
    N_out = params[-1][0].shape[1]
    grid = (B_pad // batch_tile,)

    def batch_map(i):
        return (i, 0)

    def rep_map(i):
        return (0, 0)

    in_specs = [pl.BlockSpec((batch_tile, Kp), batch_map)]
    flat_params = []
    for (w, b) in params:
        in_specs.append(pl.BlockSpec(w.shape, rep_map))   # resident weight block
        in_specs.append(pl.BlockSpec(b.shape, rep_map))   # resident (1, Np) bias
        flat_params += [w, b]

    return pl.pallas_call(
        _fused_mlp_kernel,
        out_shape=jax.ShapeDtypeStruct((B_pad, N_out), jnp.float32),
        grid=grid,
        in_specs=in_specs,
        out_specs=pl.BlockSpec((batch_tile, N_out), batch_map),
        compiler_params=pltpu.CompilerParams(
            dimension_semantics=("parallel",)),   # shards batch tiles across TCs (v7x)
    )(x_pad, *flat_params)


def init_linear_params(key, in_features, out_features):
    """Deterministic init mimicking nn.Linear's uniform(-1/sqrt(in), 1/sqrt(in))."""
    k_w, k_b = jax.random.split(key)
    bound = 1.0 / jnp.sqrt(jnp.float32(in_features))
    w = jax.random.uniform(
        k_w, (in_features, out_features), jnp.float32, minval=-bound, maxval=bound
    )
    b = jax.random.uniform(
        k_b, (out_features,), jnp.float32, minval=-bound, maxval=bound
    )
    return w, b


class FullyConnectedNetPallas:
    def __init__(self, key, input_dim, layer1_dim, layer2_dim, layer3_dim,
                 num_classes):
        self.input_dim = input_dim
        self.num_classes = num_classes
        dims = [input_dim, layer1_dim, layer2_dim, layer3_dim, num_classes]
        pdims = [_round_up(d, _LANE) for d in dims]
        self.padded_input_dim = pdims[0]

        keys = jax.random.split(key, 4)
        params = []
        for i in range(4):
            w, b = init_linear_params(keys[i], dims[i], dims[i + 1])
            # Zero-padded bf16 weights (lane-dense everywhere) + f32 biases.
            wp = jnp.zeros((pdims[i], pdims[i + 1]), jnp.bfloat16)
            wp = wp.at[:dims[i], :dims[i + 1]].set(w.astype(jnp.bfloat16))
            bp = jnp.zeros((1, pdims[i + 1]), jnp.float32)
            bp = bp.at[0, :dims[i + 1]].set(b)
            params.append((wp, bp))
        self.params = params

    @staticmethod
    def _choose_tile(B):
        # >= 8 rows (sublane), ensure >=2 grid steps once the batch permits
        # (uses both TensorCores on v7x), cap at the preferred 512-row tile.
        b8 = _round_up(max(B, _SUBLANE), _SUBLANE)
        half = _round_up(max(b8 // 2, _SUBLANE), _SUBLANE)
        return min(_PREFERRED_TILE, half)

    def _prepare_input(self, x):
        # nn.Flatten(): (B, C, H, W) -> (B, C*H*W), row-major (matches torch).
        # Keep producer dtype (f32); the bf16 cast happens inside the kernel.
        B = x.shape[0]
        h = x.reshape(B, -1)
        assert h.shape[1] == self.input_dim
        tile = self._choose_tile(B)
        B_pad = _round_up(max(B, _SUBLANE), tile)
        Kp = self.padded_input_dim
        if B_pad != B or Kp != self.input_dim:
            # Zero-pad: padded rows/cols flow through zero weight columns and
            # are sliced off in __call__ (no garbage, no reductions over them).
            h = jnp.pad(h, ((0, B_pad - B), (0, Kp - self.input_dim)))
        return h, tile

    def __call__(self, x):
        B = x.shape[0]
        h, tile = self._prepare_input(x)
        out = fused_mlp(h, self.params, batch_tile=tile)
        return out[:B, :self.num_classes]


def reference_forward(model, x):
    """Pure-JAX reference mirroring the kernel math (bf16 matmuls, f32 acc)."""
    h, _ = model._prepare_input(x)
    (w1, b1), (w2, b2), (w3, b3), (w4, b4) = model.params
    h = jnp.maximum(jnp.dot(h.astype(jnp.bfloat16), w1,
                            preferred_element_type=jnp.float32) + b1, 0.0)
    h = jnp.maximum(jnp.dot(h.astype(jnp.bfloat16), w2,
                            preferred_element_type=jnp.float32) + b2, 0.0)
    h = jnp.maximum(jnp.dot(h.astype(jnp.bfloat16), w3,
                            preferred_element_type=jnp.float32) + b3, 0.0)
    h = jnp.dot(h.astype(jnp.bfloat16), w4,
                preferred_element_type=jnp.float32) + b4
    return h[:x.shape[0], :model.num_classes]


if __name__ == "__main__":
    key = jax.random.PRNGKey(0)
    k_x, k_p = jax.random.split(key)

    # Small example consistent with the module: NCHW input flattened to input_dim
    B, C, H, W = 2, 4, 16, 16
    input_dim = C * H * W            # 1024
    layer1_dim, layer2_dim, layer3_dim = 128, 128, 64
    num_classes = 10

    x = jax.random.normal(k_x, (B, C, H, W), dtype=jnp.float32)

    model = FullyConnectedNetPallas(
        k_p, input_dim, layer1_dim, layer2_dim, layer3_dim, num_classes
    )

    out = model(x)
    out = jax.block_until_ready(out)

    ref = reference_forward(model, x)
    assert out.shape == (B, num_classes)
    assert jnp.allclose(out, ref, atol=1e-3, rtol=1e-3), (
        f"max abs err = {jnp.max(jnp.abs(out - ref))}"
    )

    print("KERNEL_OK")
</pallas_src>

<mosaic_0001>
module attributes {stable_mosaic.version = 11 : i64} {
  func.func @_fused_mlp_kernel(%arg0: i32, %arg1: memref<8x1024xf32, #tpu.memory_space<vmem>>, %arg2: memref<1024x128xbf16, #tpu.memory_space<vmem>>, %arg3: memref<1x128xf32, #tpu.memory_space<vmem>>, %arg4: memref<128x128xbf16, #tpu.memory_space<vmem>>, %arg5: memref<1x128xf32, #tpu.memory_space<vmem>>, %arg6: memref<128x128xbf16, #tpu.memory_space<vmem>>, %arg7: memref<1x128xf32, #tpu.memory_space<vmem>>, %arg8: memref<128x128xbf16, #tpu.memory_space<vmem>>, %arg9: memref<1x128xf32, #tpu.memory_space<vmem>>, %arg10: memref<8x128xf32, #tpu.memory_space<vmem>>) attributes {dimension_semantics = [#tpu.dimension_semantics<parallel>], iteration_bounds = array<i64: 1>, scalar_prefetch = 0 : i64, scratch_operands = 0 : i64, tpu.core_type = #tpu.core_type<tc>, window_params = [{transform_indices = @transform_0, window_bounds = array<i64: 8, 1024>}, {pipeline_mode = #tpu.pipeline_mode<synchronous>, transform_indices = @transform_1, window_bounds = array<i64: 1024, 128>}, {pipeline_mode = #tpu.pipeline_mode<synchronous>, transform_indices = @transform_2, window_bounds = array<i64: 1, 128>}, {pipeline_mode = #tpu.pipeline_mode<synchronous>, transform_indices = @transform_3, window_bounds = array<i64: 128, 128>}, {pipeline_mode = #tpu.pipeline_mode<synchronous>, transform_indices = @transform_4, window_bounds = array<i64: 1, 128>}, {pipeline_mode = #tpu.pipeline_mode<synchronous>, transform_indices = @transform_5, window_bounds = array<i64: 128, 128>}, {pipeline_mode = #tpu.pipeline_mode<synchronous>, transform_indices = @transform_6, window_bounds = array<i64: 1, 128>}, {pipeline_mode = #tpu.pipeline_mode<synchronous>, transform_indices = @transform_7, window_bounds = array<i64: 128, 128>}, {pipeline_mode = #tpu.pipeline_mode<synchronous>, transform_indices = @transform_8, window_bounds = array<i64: 1, 128>}, {transform_indices = @transform_9, window_bounds = array<i64: 8, 128>}]} {
    %c0 = arith.constant 0 : index
    %c0_0 = arith.constant 0 : index
    %0 = vector.load %arg1[%c0, %c0_0] : memref<8x1024xf32, #tpu.memory_space<vmem>>, vector<8x1024xf32>
    %1 = arith.truncf %0 : vector<8x1024xf32> to vector<8x1024xbf16>
    %c0_1 = arith.constant 0 : index
    %c0_2 = arith.constant 0 : index
    %2 = vector.load %arg2[%c0_1, %c0_2] : memref<1024x128xbf16, #tpu.memory_space<vmem>>, vector<1024x128xbf16>
    %cst = arith.constant dense<0.000000e+00> : vector<8x128xf32>
    %3 = tpu.matmul %1, %2, %cst {dimension_numbers = #tpu.dot_dimension_numbers<[1], [0], [0], [1], [0, 0, 1, 1], [], []>} : vector<8x1024xbf16>, vector<1024x128xbf16>, vector<8x128xf32> -> vector<8x128xf32>
    %c0_3 = arith.constant 0 : index
    %c0_4 = arith.constant 0 : index
    %4 = vector.load %arg3[%c0_3, %c0_4] : memref<1x128xf32, #tpu.memory_space<vmem>>, vector<1x128xf32>
    %5 = vector.broadcast %4 : vector<1x128xf32> to vector<8x128xf32>
    %6 = arith.addf %3, %5 : vector<8x128xf32>
    %cst_5 = arith.constant 0.000000e+00 : f32
    %7 = vector.broadcast %cst_5 : f32 to vector<8x128xf32>
    %8 = arith.maximumf %6, %7 : vector<8x128xf32>
    %9 = arith.truncf %8 : vector<8x128xf32> to vector<8x128xbf16>
    %c0_6 = arith.constant 0 : index
    %c0_7 = arith.constant 0 : index
    %10 = vector.load %arg4[%c0_6, %c0_7] : memref<128x128xbf16, #tpu.memory_space<vmem>>, vector<128x128xbf16>
    %cst_8 = arith.constant dense<0.000000e+00> : vector<8x128xf32>
    %11 = tpu.matmul %9, %10, %cst_8 {dimension_numbers = #tpu.dot_dimension_numbers<[1], [0], [0], [1], [0, 0, 1, 1], [], []>} : vector<8x128xbf16>, vector<128x128xbf16>, vector<8x128xf32> -> vector<8x128xf32>
    %c0_9 = arith.constant 0 : index
    %c0_10 = arith.constant 0 : index
    %12 = vector.load %arg5[%c0_9, %c0_10] : memref<1x128xf32, #tpu.memory_space<vmem>>, vector<1x128xf32>
    %13 = vector.broadcast %12 : vector<1x128xf32> to vector<8x128xf32>
    %14 = arith.addf %11, %13 : vector<8x128xf32>
    %cst_11 = arith.constant 0.000000e+00 : f32
    %15 = vector.broadcast %cst_11 : f32 to vector<8x128xf32>
    %16 = arith.maximumf %14, %15 : vector<8x128xf32>
    %17 = arith.truncf %16 : vector<8x128xf32> to vector<8x128xbf16>
    %c0_12 = arith.constant 0 : index
    %c0_13 = arith.constant 0 : index
    %18 = vector.load %arg6[%c0_12, %c0_13] : memref<128x128xbf16, #tpu.memory_space<vmem>>, vector<128x128xbf16>
    %cst_14 = arith.constant dense<0.000000e+00> : vector<8x128xf32>
    %19 = tpu.matmul %17, %18, %cst_14 {dimension_numbers = #tpu.dot_dimension_numbers<[1], [0], [0], [1], [0, 0, 1, 1], [], []>} : vector<8x128xbf16>, vector<128x128xbf16>, vector<8x128xf32> -> vector<8x128xf32>
    %c0_15 = arith.constant 0 : index
    %c0_16 = arith.constant 0 : index
    %20 = vector.load %arg7[%c0_15, %c0_16] : memref<1x128xf32, #tpu.memory_space<vmem>>, vector<1x128xf32>
    %21 = vector.broadcast %20 : vector<1x128xf32> to vector<8x128xf32>
    %22 = arith.addf %19, %21 : vector<8x128xf32>
    %cst_17 = arith.constant 0.000000e+00 : f32
    %23 = vector.broadcast %cst_17 : f32 to vector<8x128xf32>
    %24 = arith.maximumf %22, %23 : vector<8x128xf32>
    %25 = arith.truncf %24 : vector<8x128xf32> to vector<8x128xbf16>
    %c0_18 = arith.constant 0 : index
    %c0_19 = arith.constant 0 : index
    %26 = vector.load %arg8[%c0_18, %c0_19] : memref<128x128xbf16, #tpu.memory_space<vmem>>, vector<128x128xbf16>
    %cst_20 = arith.constant dense<0.000000e+00> : vector<8x128xf32>
    %27 = tpu.matmul %25, %26, %cst_20 {dimension_numbers = #tpu.dot_dimension_numbers<[1], [0], [0], [1], [0, 0, 1, 1], [], []>} : vector<8x128xbf16>, vector<128x128xbf16>, vector<8x128xf32> -> vector<8x128xf32>
    %c0_21 = arith.constant 0 : index
    %c0_22 = arith.constant 0 : index
    %28 = vector.load %arg9[%c0_21, %c0_22] : memref<1x128xf32, #tpu.memory_space<vmem>>, vector<1x128xf32>
    %29 = vector.broadcast %28 : vector<1x128xf32> to vector<8x128xf32>
    %30 = arith.addf %27, %29 : vector<8x128xf32>
    %c0_23 = arith.constant 0 : index
    %c0_24 = arith.constant 0 : index
    %31 = vector.load %arg10[%c0_23, %c0_24] : memref<8x128xf32, #tpu.memory_space<vmem>>, vector<8x128xf32>
    tpu.vector_store %arg10[%c0_23, %c0_24], %30 {strides = array<i32>} : memref<8x128xf32, #tpu.memory_space<vmem>>, vector<8x128xf32>,
    return
  }
  func.func @transform_0(%arg0: i32) -> (i32, i32) {
    %c0_i32 = arith.constant 0 : i32
    %c0_i32_0 = arith.constant 0 : i32
    return %arg0, %c0_i32 : i32, i32
  }
  func.func @transform_1(%arg0: i32) -> (i32, i32) {
    %c0_i32 = arith.constant 0 : i32
    %c0_i32_0 = arith.constant 0 : i32
    %c0_i32_1 = arith.constant 0 : i32
    return %c0_i32, %c0_i32_0 : i32, i32
  }
  func.func @transform_2(%arg0: i32) -> (i32, i32) {
    %c0_i32 = arith.constant 0 : i32
    %c0_i32_0 = arith.constant 0 : i32
    %c0_i32_1 = arith.constant 0 : i32
    return %c0_i32, %c0_i32_0 : i32, i32
  }
  func.func @transform_3(%arg0: i32) -> (i32, i32) {
    %c0_i32 = arith.constant 0 : i32
    %c0_i32_0 = arith.constant 0 : i32
    %c0_i32_1 = arith.constant 0 : i32
    return %c0_i32, %c0_i32_0 : i32, i32
  }
  func.func @transform_4(%arg0: i32) -> (i32, i32) {
    %c0_i32 = arith.constant 0 : i32
    %c0_i32_0 = arith.constant 0 : i32
    %c0_i32_1 = arith.constant 0 : i32
    return %c0_i32, %c0_i32_0 : i32, i32
  }
  func.func @transform_5(%arg0: i32) -> (i32, i32) {
    %c0_i32 = arith.constant 0 : i32
    %c0_i32_0 = arith.constant 0 : i32
    %c0_i32_1 = arith.constant 0 : i32
    return %c0_i32, %c0_i32_0 : i32, i32
  }
  func.func @transform_6(%arg0: i32) -> (i32, i32) {
    %c0_i32 = arith.constant 0 : i32
    %c0_i32_0 = arith.constant 0 : i32
    %c0_i32_1 = arith.constant 0 : i32
    return %c0_i32, %c0_i32_0 : i32, i32
  }
  func.func @transform_7(%arg0: i32) -> (i32, i32) {
    %c0_i32 = arith.constant 0 : i32
    %c0_i32_0 = arith.constant 0 : i32
    %c0_i32_1 = arith.constant 0 : i32
    return %c0_i32, %c0_i32_0 : i32, i32
  }
  func.func @transform_8(%arg0: i32) -> (i32, i32) {
    %c0_i32 = arith.constant 0 : i32
    %c0_i32_0 = arith.constant 0 : i32
    %c0_i32_1 = arith.constant 0 : i32
    return %c0_i32, %c0_i32_0 : i32, i32
  }
  func.func @transform_9(%arg0: i32) -> (i32, i32) {
    %c0_i32 = arith.constant 0 : i32
    %c0_i32_0 = arith.constant 0 : i32
    return %arg0, %c0_i32 : i32, i32
  }
}

</mosaic_0001>

<bundles_post_ra>
// kernel: tpu_custom_call.1
= control target key start
LH: loop header
LB: loop body
LE: loop exit
PB: predicated region body
PF: predicated region fallthrough
CT: control target
= control target key end

     0   :  { %14 = vsyncpa [#allocation3], 0  ;;  %s1777_s0 = inlined_call_operand.hbm [shape: f32[8,1024], index: 0, kind: input, shape index: {}]   ;;  %s1778_s1 = inlined_call_operand.hbm [shape: bf16[1024,128], index: 1, kind: input, shape index: {}]   ;;  %s1779_s2 = inlined_call_operand.vmem [shape: f32[1,128], index: 2, kind: input, shape index: {}]   ;;  %s1780_s3 = inlined_call_operand.hbm [shape: bf16[128,128], index: 3, kind: input, shape index: {}]   ;;  %s1781_s4 = inlined_call_operand.vmem [shape: f32[1,128], index: 4, kind: input, shape index: {}]   ;;  %s1782_s5 = inlined_call_operand.hbm [shape: bf16[128,128], index: 5, kind: input, shape index: {}]   ;;  %s1783_s6 = inlined_call_operand.vmem [shape: f32[1,128], index: 6, kind: input, shape index: {}]   ;;  %s1784_s7 = inlined_call_operand.hbm [shape: bf16[128,128], index: 7, kind: input, shape index: {}]   ;;  %s1785_s8 = inlined_call_operand.vmem [shape: f32[1,128], index: 8, kind: input, shape index: {}]   ;;  %s1786_s9 = inlined_call_operand.hbm [shape: f32[8,128], index: 9, kind: output, shape index: {}]  }
   0x1   :  { %15 = vsyncpa [#allocation6], 0 }
   0x2   :  { %16 = vsyncpa [#allocation9], 0 }
   0x3   :  { %17 = vsyncpa [#allocation4], 0  ;;  %s1645_s30 = smov [#allocation5]  }
   0x4   :  { %s33_s10 = sshll.u32 %s1645_s30, 4  ;;  %s34_s10 = int_to_ptr.vmem [resolvable:$true] %s33_s10 }
   0x5   :  { %s1525_s11 = scalar_lea.vmem %s34_s10, 8192  ;;  %p1530_p1 = scmp.lt.s32.totalorder %s34_s10, %s34_s10 }
   0x6   :  { %p1526_p0 = scmp.ne.s32.totalorder %s34_s10, %s1525_s11  ;;  %p1531_p2 = scmp.lt.s32.totalorder %s1525_s11, %s1525_s11 }
   0x8   :  { %p1532_p3 = por %p1531_p2, %p1530_p1 }
   0xa   :  { %p1533_p4 = pnand %p1532_p3, %p1526_p0 }
   0xc   :  { %1536 = shalt.err (!%p1533_p4)
}
   0xd   :  { %s1646_s12 = smov 64   ;;  %s1647_s13 = smov 4  }
   0xe   :  { %39 = dma.hbm_to_vmem [thread:$0]  %s1778_s1, 8192, %s34_s10, [#allocation6], %s1646_s12, %s1646_s12, %s1647_s13  }
   0xf   :  { %s1648_s16 = smov [#allocation8]   ;;  %s1649_s18 = smov [#allocation2]  }
  0x10   :  { %s61_s17 = sshll.u32 %s1648_s16, 4  ;;  %s24_s19 = sshll.u32 %s1649_s18, 4  ;;  %s62_s17 = int_to_ptr.vmem [resolvable:$true] %s61_s17  ;;  %s25_s19 = int_to_ptr.vmem [resolvable:$true] %s24_s19 }
  0x11   :  { %s1545_s20 = scalar_lea.vmem %s62_s17, 1024  ;;  %p1550_p6 = scmp.lt.s32.totalorder %s62_s17, %s62_s17 }
  0x12   :  { %p1546_p5 = scmp.ne.s32.totalorder %s62_s17, %s1545_s20  ;;  %p1551_p7 = scmp.lt.s32.totalorder %s1545_s20, %s1545_s20 }
  0x14   :  { %p1552_p8 = por %p1551_p7, %p1550_p6 }
  0x16   :  { %p1553_p9 = pnand %p1552_p8, %p1546_p5 }
  0x18   :  { %1556 = shalt.err (!%p1553_p9)
}
  0x19   :  { %67 = dma.hbm_to_vmem [thread:$0]  %s1782_s5, 1024, %s62_s17, [#allocation9], %s1646_s12, %s1646_s12, %s1647_s13  }
  0x1a   :  { %s1565_s1 = scalar_lea.vmem %s25_s19, 1024  ;;  %p1570_p11 = scmp.lt.s32.totalorder %s25_s19, %s25_s19 }
  0x1b   :  { %p1566_p10 = scmp.ne.s32.totalorder %s25_s19, %s1565_s1  ;;  %p1571_p12 = scmp.lt.s32.totalorder %s1565_s1, %s1565_s1 }
  0x1d   :  { %p1572_p13 = por %p1571_p12, %p1570_p11 }
  0x1f   :  { %p1573_p0 = pnand %p1572_p13, %p1566_p10 }
  0x21   :  { %1576 = shalt.err (!%p1573_p0)
}
  0x22   :  { %27 = dma.hbm_to_vmem [thread:$0]  %s1777_s0, 1024, %s25_s19, [#allocation3]  }
  0x23   :  { %s1650_s25 = smov [#allocation7]   ;;  %s1651_s27 = smov [#allocation10]  }
  0x24   :  { %s47_s26 = sshll.u32 %s1650_s25, 4  ;;  %s75_s28 = sshll.u32 %s1651_s27, 4  ;;  %s48_s26 = int_to_ptr.vmem [resolvable:$true] %s47_s26  ;;  %s76_s28 = int_to_ptr.vmem [resolvable:$true] %s75_s28 }
  0x25   :  { %s1585_s29 = scalar_lea.vmem %s48_s26, 1024  ;;  %p1590_p2 = scmp.lt.s32.totalorder %s48_s26, %s48_s26 }
  0x26   :  { %p1586_p1 = scmp.ne.s32.totalorder %s48_s26, %s1585_s29  ;;  %p1591_p3 = scmp.lt.s32.totalorder %s1585_s29, %s1585_s29 }
  0x28   :  { %p1592_p4 = por %p1591_p3, %p1590_p2 }
  0x2a   :  { %p1593_p5 = pnand %p1592_p4, %p1586_p1 }
  0x2c   :  { %1596 = shalt.err (!%p1593_p5)
}
  0x2d   :  { %53 = dma.hbm_to_vmem [thread:$0]  %s1780_s3, 1024, %s48_s26, [#allocation6], %s1646_s12, %s1646_s12, %s1647_s13  }
  0x2e   :  { %s1605_s0 = scalar_lea.vmem %s76_s28, 1024  ;;  %p1610_p7 = scmp.lt.s32.totalorder %s76_s28, %s76_s28 }
  0x2f   :  { %p1606_p6 = scmp.ne.s32.totalorder %s76_s28, %s1605_s0  ;;  %p1611_p8 = scmp.lt.s32.totalorder %s1605_s0, %s1605_s0 }
  0x31   :  { %p1612_p9 = por %p1611_p8, %p1610_p7 }
  0x33   :  { %p1613_p10 = pnand %p1612_p9, %p1606_p6 }
  0x35   :  { %1616 = shalt.err (!%p1613_p10)
}
  0x36   :  { %81 = dma.hbm_to_vmem [thread:$0]  %s1784_s7, 1024, %s76_s28, [#allocation9], %s1646_s12, %s1646_s12, %s1647_s13  }
  0x37   :  { %1637 = dma.done.wait [#allocation3], 1024  }
  0x38   :  { %1638 = vsyncadd [#allocation3], 4294966272 }
  0x39   :  { %1639 = dma.done.wait [#allocation6], 9216  }
  0x3a   :  { %1640 = vsyncadd [#allocation6], 4294958080 }
  0x3b   :  { %1641 = dma.done.wait [#allocation9], 2048  }
  0x3c   :  { %1642 = vsyncadd [#allocation9], 4294965248  ;;  %v1429_v0 = vld [vmem:[#allocation5 + $0x78] sm:$0xff]   ;;  %v1433_v4 = vld [vmem:[#allocation5 + $0x70] sm:$0xff]   ;;  %vm1653_vm0 = vmmov 0   ;;  %s1654_s16 = smov [#allocation11]  }
  0x3d   :  { %v1430_v1 = vld [vmem:[#allocation5 + $0xf8] sm:$0xff]   ;;  %1244 = vmatprep.subr.bf16.mxu0 %v1429_v0  ;;  %v1434_v5 = vld [vmem:[#allocation5 + $0xf0] sm:$0xff]   ;;  %v1437_v8 = vld [vmem:[#allocation5 + $0x68] sm:$0xff]   ;;  %s1141_s17 = sshll.u32 %s1654_s16, 4  ;;  %s1142_s17 = int_to_ptr.vmem [resolvable:$true] %s1141_s17 }
  0x3e   :  { %v1431_v2 = vld [vmem:[#allocation5 + $0x38] sm:$0xff]   ;;  %1266 = vmatprep.subr.bf16.mxu1 %v1430_v1  ;;  %v1435_v6 = vld [vmem:[#allocation5 + $0x30] sm:$0xff]   ;;  %v1438_v9 = vld [vmem:[#allocation5 + $0xe8] sm:$0xff]   ;;  %p1622_p12 = scmp.lt.s32.totalorder %s1142_s17, %s1142_s17 }
  0x3f   :  { %v1432_v3 = vld [vmem:[#allocation5 + $0xb8] sm:$0xff]   ;;  %1245 = vmatpush3.bf16.msra.mxu0 %v1431_v2  ;;  %v1436_v7 = vld [vmem:[#allocation5 + $0xb0] sm:$0xff]   ;;  %v1439_v10 = vld [vmem:[#allocation5 + $0x28] sm:$0xff]  }
  0x40   :  { %1267 = vmatpush3.bf16.msra.mxu1 %v1432_v3  ;;  %1246 = vmatprep.subr.bf16.mxu0 %v1433_v4  ;;  %v1440_v11 = vld [vmem:[#allocation5 + $0xa8] sm:$0xff]   ;;  %v1441_v12 = vld [vmem:[#allocation5 + $0x60] sm:$0xff]   ;;  %v1445_v16 = vld [vmem:[#allocation5 + $0x58] sm:$0xff]  }
  0x41   :  { %1268 = vmatprep.subr.bf16.mxu1 %v1434_v5  ;;  %v1442_v13 = vld [vmem:[#allocation5 + $0xe0] sm:$0xff]   ;;  %v1446_v17 = vld [vmem:[#allocation5 + $0xd8] sm:$0xff]   ;;  %v1449_v20 = vld [vmem:[#allocation5 + $0x50] sm:$0xff]  }
  0x42   :  { %v1443_v14 = vld [vmem:[#allocation5 + $0x20] sm:$0xff]   ;;  %v1447_v18 = vld [vmem:[#allocation5 + $0x18] sm:$0xff]   ;;  %v1450_v21 = vld [vmem:[#allocation5 + $0xd0] sm:$0xff]  }
  0x43   :  { %1247 = vmatpush3.bf16.msra.mxu0 %v1435_v6  ;;  %v1444_v15 = vld [vmem:[#allocation5 + $0xa0] sm:$0xff]   ;;  %v1448_v19 = vld [vmem:[#allocation5 + $0x98] sm:$0xff]   ;;  %v1451_v22 = vld [vmem:[#allocation5 + $0x10] sm:$0xff]  }
  0x44   :  { %1269 = vmatpush3.bf16.msra.mxu1 %v1436_v7  ;;  %1248 = vmatprep.subr.bf16.mxu0 %v1437_v8  ;;  %v1452_v23 = vld [vmem:[#allocation5 + $0x90] sm:$0xff]   ;;  %v1453_v24 = vld [vmem:[#allocation5 + $0x48] sm:$0xff]   ;;  %v1457_v28 = vld [vmem:[#allocation5 + $0x40] sm:$0xff]  }
  0x45   :  { %1270 = vmatprep.subr.bf16.mxu1 %v1438_v9  ;;  %v1454_v25 = vld [vmem:[#allocation5 + $0xc8] sm:$0xff]   ;;  %v1458_v29 = vld [vmem:[#allocation5 + $0xc0] sm:$0xff]   ;;  %v103_v33 = vld [vmem:[#allocation2 + $0x18] sm:$0xff] }
  0x46   :  { %v1455_v26 = vld [vmem:[#allocation5 + $0x8] sm:$0xff]   ;;  %v1459_v30 = vld [vmem:[#allocation5] sm:$0xff]   ;;  %v111_v36 = vpack.c.bf16 %v103_v33, %v103_v33  ;;  %v102_v38 = vld [vmem:[#allocation2 + $0x10] sm:$0xff] }
  0x47   :  { %1249 = vmatpush3.bf16.msra.mxu0 %v1439_v10  ;;  %v1456_v27 = vld [vmem:[#allocation5 + $0x88] sm:$0xff]   ;;  %v1460_v31 = vld [vmem:[#allocation5 + $0x80] sm:$0xff]   ;;  %v110_v39 = vpack.c.bf16 %v102_v38, %v102_v38  ;;  %v1461_v40 = vld [vmem:[#allocation5 + $0x178] sm:$0xff]  }
  0x48   :  { %1271 = vmatpush3.bf16.msra.mxu1 %v1440_v11  ;;  %1250 = vmatprep.subr.bf16.mxu0 %v1441_v12  ;;  %v101_v32 = vld [vmem:[#allocation2 + $0x8] sm:$0xff]  ;;  %v100_v34 = vld [vmem:[#allocation2] sm:$0xff]  ;;  %v1462_v41 = vld [vmem:[#allocation5 + $0x1f8] sm:$0xff]  }
  0x49   :  { %1272 = vmatprep.subr.bf16.mxu1 %v1442_v13  ;;  %v109_v35 = vpack.c.bf16 %v101_v32, %v101_v32  ;;  %v108_v37 = vpack.c.bf16 %v100_v34, %v100_v34  ;;  %707 = vmatprep.mubr.bf16.mxu1 %v111_v36  ;;  %v1463_v42 = vld [vmem:[#allocation5 + $0x138] sm:$0xff]   ;;  %v1465_v44 = vld [vmem:[#allocation5 + $0x170] sm:$0xff]   ;;  %v1469_v48 = vld [vmem:[#allocation5 + $0x168] sm:$0xff]  }
  0x4a   :  { %v1464_v43 = vld [vmem:[#allocation5 + $0x1b8] sm:$0xff]   ;;  %v1466_v45 = vld [vmem:[#allocation5 + $0x1f0] sm:$0xff]   ;;  %v1470_v49 = vld [vmem:[#allocation5 + $0x1e8] sm:$0xff]  }
  0x4b   :  { %1251 = vmatpush3.bf16.msra.mxu0 %v1443_v14  ;;  %667 = vmatprep.mubr.bf16.mxu0 %v109_v35  ;;  %v1467_v46 = vld [vmem:[#allocation5 + $0x130] sm:$0xff]   ;;  %v1471_v50 = vld [vmem:[#allocation5 + $0x128] sm:$0xff]   ;;  %v1473_v52 = vld [vmem:[#allocation5 + $0x160] sm:$0xff]  }
  0x4c   :  { %1273 = vmatpush3.bf16.msra.mxu1 %v1444_v15  ;;  %1252 = vmatprep.subr.bf16.mxu0 %v1445_v16  ;;  %v1468_v47 = vld [vmem:[#allocation5 + $0x1b0] sm:$0xff]   ;;  %v1472_v51 = vld [vmem:[#allocation5 + $0x1a8] sm:$0xff]   ;;  %v1474_v53 = vld [vmem:[#allocation5 + $0x1e0] sm:$0xff]  }
  0x4d   :  { %1274 = vmatprep.subr.bf16.mxu1 %v1446_v17  ;;  %v1475_v54 = vld [vmem:[#allocation5 + $0x120] sm:$0xff]   ;;  %v1477_v56 = vld [vmem:[#allocation5 + $0x158] sm:$0xff]   ;;  %v1481_v60 = vld [vmem:[#allocation5 + $0x150] sm:$0xff]   ;;  %v1652_v17 = vmov 0.0  }
  0x4e   :  { %v1476_v55 = vld [vmem:[#allocation5 + $0x1a0] sm:$0xff]   ;;  %v1478_v57 = vld [vmem:[#allocation5 + $0x1d8] sm:$0xff]   ;;  %v1482_v61 = vld [vmem:[#allocation5 + $0x1d0] sm:$0xff]  }
  0x4f   :  { %1253 = vmatpush3.bf16.msra.mxu0 %v1447_v18  ;;  %v1479_v58 = vld [vmem:[#allocation5 + $0x118] sm:$0xff]   ;;  %v1483_v62 = vld [vmem:[#allocation5 + $0x110] sm:$0xff]   ;;  %v1485_v0 = vld [vmem:[#allocation5 + $0x148] sm:$0xff]  }
  0x50   :  { %1275 = vmatpush3.bf16.msra.mxu1 %v1448_v19  ;;  %1254 = vmatprep.subr.bf16.mxu0 %v1449_v20  ;;  %v1480_v59 = vld [vmem:[#allocation5 + $0x198] sm:$0xff]   ;;  %v1484_v63 = vld [vmem:[#allocation5 + $0x190] sm:$0xff]   ;;  %v1486_v1 = vld [vmem:[#allocation5 + $0x1c8] sm:$0xff]  }
  0x51   :  { %1276 = vmatprep.subr.bf16.mxu1 %v1450_v21  ;;  %v1487_v2 = vld [vmem:[#allocation5 + $0x108] sm:$0xff]   ;;  %v1489_v4 = vld [vmem:[#allocation5 + $0x140] sm:$0xff]   ;;  %v107_v9 = vld [vmem:[#allocation2 + $0x38] sm:$0xff] }
  0x52   :  { %v1488_v3 = vld [vmem:[#allocation5 + $0x188] sm:$0xff]   ;;  %v1490_v5 = vld [vmem:[#allocation5 + $0x1c0] sm:$0xff]   ;;  %v115_v11 = vpack.c.bf16 %v107_v9, %v107_v9  ;;  %v106_v13 = vld [vmem:[#allocation2 + $0x30] sm:$0xff] }
  0x53   :  { %1255 = vmatpush3.bf16.msra.mxu0 %v1451_v22  ;;  %v1491_v6 = vld [vmem:[#allocation5 + $0x100] sm:$0xff]   ;;  %v105_v8 = vld [vmem:[#allocation2 + $0x28] sm:$0xff]  ;;  %v114_v15 = vpack.c.bf16 %v106_v13, %v106_v13  ;;  %v1493_v16 = vld [vmem:[#allocation7 + $0x38] sm:$0xff]  }
  0x54   :  { %1277 = vmatpush3.bf16.msra.mxu1 %v1452_v23  ;;  %1256 = vmatprep.subr.bf16.mxu0 %v1453_v24  ;;  %v1492_v7 = vld [vmem:[#allocation5 + $0x180] sm:$0xff]   ;;  %v113_v10 = vpack.c.bf16 %v105_v8, %v105_v8  ;;  %v1494_v18 = vld [vmem:[#allocation7 + $0x30] sm:$0xff]   ;;  %v1495_v19 = vld [vmem:[#allocation7 + $0x28] sm:$0xff]  }
  0x55   :  { %1278 = vmatprep.subr.bf16.mxu1 %v1454_v25  ;;  %v104_v12 = vld [vmem:[#allocation2 + $0x20] sm:$0xff]  ;;  %v1497_v21 = vld [vmem:[#allocation7 + $0x18] sm:$0xff]   ;;  %v1498_v22 = vld [vmem:[#allocation7 + $0x10] sm:$0xff]  }
  0x56   :  { %v112_v14 = vpack.c.bf16 %v104_v12, %v104_v12  ;;  %v1496_v20 = vld [vmem:[#allocation7 + $0x20] sm:$0xff]   ;;  %v1499_v23 = vld [vmem:[#allocation7 + $0x8] sm:$0xff]   ;;  %v1501_v25 = vld [vmem:[#allocation8 + $0x38] sm:$0xff]  }
  0x57   :  { %1257 = vmatpush3.bf16.msra.mxu0 %v1455_v26  ;;  %v1500_v24 = vld [vmem:[#allocation7] sm:$0xff]   ;;  %v1502_v26 = vld [vmem:[#allocation8 + $0x30] sm:$0xff]  }
  0x58   :  { %1279 = vmatpush3.bf16.msra.mxu1 %v1456_v27  ;;  %1258 = vmatprep.subr.bf16.mxu0 %v1457_v28  ;;  %v1503_v27 = vld [vmem:[#allocation8 + $0x28] sm:$0xff]   ;;  %v1504_v28 = vld [vmem:[#allocation8 + $0x20] sm:$0xff]  }
  0x59   :  { %1280 = vmatprep.subr.bf16.mxu1 %v1458_v29  ;;  %v1505_v29 = vld [vmem:[#allocation8 + $0x18] sm:$0xff]   ;;  %v1226_v12 = vld [vmem:[%s1783_s6] ss:$0 sm:$0xff]  ;;  %s1617_s6 = scalar_lea.vmem %s1142_s17, 128 }
  0x5a   :  { %p1618_p11 = scmp.ne.s32.totalorder %s1142_s17, %s1617_s6  ;;  %p1623_p13 = scmp.lt.s32.totalorder %s1617_s6, %s1617_s6 }
  0x5b   :  { %1259 = vmatpush3.bf16.msra.mxu0 %v1459_v30  ;;  %v1506_v30 = vld [vmem:[#allocation8 + $0x10] sm:$0xff]  }
  0x5c   :  { %1281 = vmatpush3.bf16.msra.mxu1 %v1460_v31  ;;  %1288 = vmatprep.subr.bf16.mxu0 %v1461_v40  ;;  %v1152_v40 = vld [vmem:[%s1779_s2] ss:$0 sm:$0xff]  ;;  %p1624_p0 = por %p1623_p13, %p1622_p12 }
  0x5d   :  { %1310 = vmatprep.subr.bf16.mxu1 %v1462_v41 }
  0x5e   :  { %668 = vmatmul.mubr.bf16.vlgmr.msra.gmra.mxu0 %v108_v37  ;;  %p1625_p1 = pnand %p1624_p0, %p1618_p11 }
  0x5f   :  { %708 = vmatmul.mubr.bf16.vlgmr.msra.gmra.mxu1 %v110_v39  ;;  %1289 = vmatpush3.bf16.msra.mxu0 %v1463_v42 }
  0x60   :  { %1311 = vmatpush3.bf16.msra.mxu1 %v1464_v43  ;;  %1290 = vmatprep.subr.bf16.mxu0 %v1465_v44 }
  0x61   :  { %1312 = vmatprep.subr.bf16.mxu1 %v1466_v45  ;;  %747 = vmatprep.mubr.bf16.mxu0 %v113_v10  ;;  %v1515_v10 = vld [vmem:[#allocation10 + $0x8] sm:$0xff]  }
  0x62   :  { %787 = vmatprep.mubr.bf16.mxu1 %v115_v11  ;;  %v1516_v11 = vld [vmem:[#allocation10] sm:$0xff]  }
  0x63   :  { %1291 = vmatpush3.bf16.msra.mxu0 %v1467_v46 }
  0x64   :  { %1313 = vmatpush3.bf16.msra.mxu1 %v1468_v47  ;;  %1292 = vmatprep.subr.bf16.mxu0 %v1469_v48 }
  0x65   :  { %1314 = vmatprep.subr.bf16.mxu1 %v1470_v49 }
  0x67   :  { %1293 = vmatpush3.bf16.msra.mxu0 %v1471_v50 }
  0x68   :  { %1315 = vmatpush3.bf16.msra.mxu1 %v1472_v51  ;;  %1294 = vmatprep.subr.bf16.mxu0 %v1473_v52 }
  0x69   :  { %1316 = vmatprep.subr.bf16.mxu1 %v1474_v53 }
  0x6b   :  { %1295 = vmatpush3.bf16.msra.mxu0 %v1475_v54 }
  0x6c   :  { %1317 = vmatpush3.bf16.msra.mxu1 %v1476_v55  ;;  %1296 = vmatprep.subr.bf16.mxu0 %v1477_v56 }
  0x6d   :  { %1318 = vmatprep.subr.bf16.mxu1 %v1478_v57 }
  0x6f   :  { %1297 = vmatpush3.bf16.msra.mxu0 %v1479_v58  ;;  %v1507_v58 = vld [vmem:[#allocation8 + $0x8] sm:$0xff]  }
  0x70   :  { %1319 = vmatpush3.bf16.msra.mxu1 %v1480_v59  ;;  %1298 = vmatprep.subr.bf16.mxu0 %v1481_v60  ;;  %v1508_v59 = vld [vmem:[#allocation8] sm:$0xff]   ;;  %v1509_v60 = vld [vmem:[#allocation10 + $0x38] sm:$0xff]  }
  0x71   :  { %1320 = vmatprep.subr.bf16.mxu1 %v1482_v61  ;;  %v1510_v61 = vld [vmem:[#allocation10 + $0x30] sm:$0xff]  }
  0x73   :  { %1299 = vmatpush3.bf16.msra.mxu0 %v1483_v62  ;;  %v1511_v62 = vld [vmem:[#allocation10 + $0x28] sm:$0xff]  }
  0x74   :  { %1321 = vmatpush3.bf16.msra.mxu1 %v1484_v63  ;;  %1300 = vmatprep.subr.bf16.mxu0 %v1485_v0  ;;  %v1512_v63 = vld [vmem:[#allocation10 + $0x20] sm:$0xff]   ;;  %v1513_v0 = vld [vmem:[#allocation10 + $0x18] sm:$0xff]  }
  0x75   :  { %1322 = vmatprep.subr.bf16.mxu1 %v1486_v1  ;;  %v1514_v1 = vld [vmem:[#allocation10 + $0x10] sm:$0xff]  }
  0x77   :  { %1301 = vmatpush3.bf16.msra.mxu0 %v1487_v2  ;;  %v1217_v2 = vld [vmem:[%s1781_s4] ss:$0 sm:$0xff] }
  0x78   :  { %1323 = vmatpush3.bf16.msra.mxu1 %v1488_v3  ;;  %1302 = vmatprep.subr.bf16.mxu0 %v1489_v4 }
  0x79   :  { %1324 = vmatprep.subr.bf16.mxu1 %v1490_v5 }
  0x7b   :  { %1303 = vmatpush3.bf16.msra.mxu0 %v1491_v6 }
  0x7c   :  { %1325 = vmatpush3.bf16.msra.mxu1 %v1492_v7  ;;  %1359 = vmatprep.subr.bf16.mxu0 %v1652_v17 }
  0x7d   :  { %1379 = vmatprep.subr.bf16.mxu1 %v1652_v17 }
  0x7e   :  { %748 = vmatmul.mubr.bf16.vlgmr.msra.gmra.mxu0 %v112_v14 }
  0x7f   :  { %788 = vmatmul.mubr.bf16.vlgmr.msra.gmra.mxu1 %v114_v15  ;;  %1360 = vmatpush3.bf16.msra.mxu0 %v1493_v16 }
  0x80   :  { %1361 = vmatprep.subr.bf16.mxu0 %v1652_v17  ;;  %1375 = vmatprep.mubr.msk.bf16.mxu0 %vm1653_vm0, %v1652_v17 }
  0x81   :  { %1395 = vmatprep.mubr.msk.bf16.mxu1 %vm1653_vm0, %v1652_v17  ;;  %1380 = vmatpush3.bf16.msra.mxu1 %v1501_v25 }
  0x82   :  { %1381 = vmatprep.subr.bf16.mxu1 %v1652_v17 }
  0x83   :  { %1362 = vmatpush3.bf16.msra.mxu0 %v1494_v18 }
  0x84   :  { %1363 = vmatprep.subr.bf16.mxu0 %v1652_v17 }
  0x85   :  { %1382 = vmatpush3.bf16.msra.mxu1 %v1502_v26 }
  0x86   :  { %1383 = vmatprep.subr.bf16.mxu1 %v1652_v17 }
  0x87   :  { %1364 = vmatpush3.bf16.msra.mxu0 %v1495_v19 }
  0x88   :  { %1365 = vmatprep.subr.bf16.mxu0 %v1652_v17 }
  0x89   :  { %1384 = vmatpush3.bf16.msra.mxu1 %v1503_v27 }
  0x8a   :  { %1385 = vmatprep.subr.bf16.mxu1 %v1652_v17 }
  0x8b   :  { %1366 = vmatpush3.bf16.msra.mxu0 %v1496_v20 }
  0x8c   :  { %1367 = vmatprep.subr.bf16.mxu0 %v1652_v17 }
  0x8d   :  { %1386 = vmatpush3.bf16.msra.mxu1 %v1504_v28 }
  0x8e   :  { %1387 = vmatprep.subr.bf16.mxu1 %v1652_v17 }
  0x8f   :  { %1368 = vmatpush3.bf16.msra.mxu0 %v1497_v21  ;;  %v1235_v21 = vld [vmem:[%s1785_s8] ss:$0 sm:$0xff] }
  0x90   :  { %1369 = vmatprep.subr.bf16.mxu0 %v1652_v17 }
  0x91   :  { %1388 = vmatpush3.bf16.msra.mxu1 %v1505_v29 }
  0x92   :  { %1389 = vmatprep.subr.bf16.mxu1 %v1652_v17 }
  0x93   :  { %1370 = vmatpush3.bf16.msra.mxu0 %v1498_v22 }
  0x94   :  { %1371 = vmatprep.subr.bf16.mxu0 %v1652_v17 }
  0x95   :  { %1390 = vmatpush3.bf16.msra.mxu1 %v1506_v30 }
  0x96   :  { %1391 = vmatprep.subr.bf16.mxu1 %v1652_v17 }
  0x97   :  { %1372 = vmatpush3.bf16.msra.mxu0 %v1499_v23 }
  0x98   :  { %1373 = vmatprep.subr.bf16.mxu0 %v1652_v17 }
  0x99   :  { %1392 = vmatpush3.bf16.msra.mxu1 %v1507_v58 }
  0x9a   :  { %1393 = vmatprep.subr.bf16.mxu1 %v1652_v17 }
  0x9b   :  { %1374 = vmatpush3.bf16.msra.mxu0 %v1500_v24 }
  0x9c   :  { %1399 = vmatprep.subr.bf16.mxu0 %v1652_v17 }
  0x9d   :  { %1394 = vmatpush3.bf16.msra.mxu1 %v1508_v59 }
 0x11e   :  { %v1260_v31 = vpop.f32.mrf.mxu0 }
 0x11f   :  { %v1282_v32 = vpop.f32.mrf.mxu1 }
 0x120   :  { %v1261_v33 = vpop.f32.mrf.mxu0 }
 0x121   :  { %v1283_v34 = vpop.f32.mrf.mxu1  ;;  %v1262_v39 = vadd.f32 %v1261_v33, %v1260_v31 }
 0x122   :  { %v1263_v35 = vpop.f32.mrf.mxu0  ;;  %v1284_v42 = vadd.f32 %v1283_v34, %v1282_v32 }
 0x123   :  { %v1285_v36 = vpop.f32.mrf.mxu1  ;;  %v670_v41 = vadd.f32 %v1262_v39, %v1152_v40 }
 0x124   :  { %v1264_v37 = vpop.f32.mrf.mxu0 }
 0x125   :  { %v1286_v38 = vpop.f32.mrf.mxu1  ;;  %v710_v46 = vadd.f32 %v1284_v42, %v670_v41 }
 0x13e   :  { %v1304_v43 = vpop.f32.mrf.mxu0 }
 0x13f   :  { %v1326_v44 = vpop.f32.mrf.mxu1 }
 0x140   :  { %v1305_v45 = vpop.f32.mrf.mxu0 }
 0x141   :  { %v1306_v47 = vadd.f32 %v1305_v45, %v1304_v43  ;;  %v1327_v48 = vpop.f32.mrf.mxu1 }
 0x142   :  { %v1307_v49 = vpop.f32.mrf.mxu0  ;;  %v1328_v51 = vadd.f32 %v1327_v48, %v1326_v44 }
 0x143   :  { %v750_v50 = vadd.f32 %v1306_v47, %v710_v46  ;;  %v1329_v52 = vpop.f32.mrf.mxu1 }
 0x144   :  { %v1308_v53 = vpop.f32.mrf.mxu0 }
 0x145   :  { %v790_v54 = vadd.f32 %v1328_v51, %v750_v50  ;;  %v1330_v55 = vpop.f32.mrf.mxu1 }
 0x147   :  { %v795_v56 = vmax.f32 %v790_v54, 0.0 }
 0x149   :  { %v796_v57 = vpack.c.bf16 %v795_v56, %v795_v56 }
 0x14b   :  { %1376 = vmatmul.mubr.bf16.vlgmr.msra.gmra.mxu0 %v796_v57 }
 0x14c   :  { %1415 = vmatprep.mubr.msk.bf16.mxu0 %vm1653_vm0, %v1652_v17  ;;  %1400 = vmatpush3.bf16.msra.mxu0 %v1509_v60 }
 0x14d   :  { %1401 = vmatprep.subr.bf16.mxu0 %v1652_v17 }
 0x150   :  { %1402 = vmatpush3.bf16.msra.mxu0 %v1510_v61 }
 0x151   :  { %1403 = vmatprep.subr.bf16.mxu0 %v1652_v17 }
 0x154   :  { %1404 = vmatpush3.bf16.msra.mxu0 %v1511_v62 }
 0x155   :  { %1405 = vmatprep.subr.bf16.mxu0 %v1652_v17 }
 0x158   :  { %1406 = vmatpush3.bf16.msra.mxu0 %v1512_v63 }
 0x159   :  { %1407 = vmatprep.subr.bf16.mxu0 %v1652_v17 }
 0x15c   :  { %1408 = vmatpush3.bf16.msra.mxu0 %v1513_v0 }
 0x15d   :  { %1409 = vmatprep.subr.bf16.mxu0 %v1652_v17 }
 0x160   :  { %1410 = vmatpush3.bf16.msra.mxu0 %v1514_v1 }
 0x161   :  { %1411 = vmatprep.subr.bf16.mxu0 %v1652_v17 }
 0x164   :  { %1412 = vmatpush3.bf16.msra.mxu0 %v1515_v10 }
 0x165   :  { %1413 = vmatprep.subr.bf16.mxu0 %v1652_v17 }
 0x168   :  { %1414 = vmatpush3.bf16.msra.mxu0 %v1516_v11 }
 0x20b   :  { %v902_v3 = vpop.f32.mrf.mxu0 }
 0x20c   :  { %v903_v4 = vadd.f32 %v1217_v2, %v902_v3 }
 0x20d   :  { %v1377_v5 = vpop.f32.mrf.mxu0 }
 0x20e   :  { %v908_v6 = vmax.f32 %v903_v4, 0.0 }
 0x20f   :  { %v905_v7 = vpop.f32.mrf.mxu0 }
 0x210   :  { %v909_v8 = vpack.c.bf16 %v908_v6, %v908_v6 }
 0x211   :  { %v1378_v9 = vpop.f32.mrf.mxu0 }
 0x212   :  { %1396 = vmatmul.mubr.bf16.vlgmr.msra.gmra.mxu1 %v909_v8 }
 0x2d2   :  { %v1015_v13 = vpop.f32.mrf.mxu1 }
 0x2d3   :  { %v1016_v14 = vadd.f32 %v1226_v12, %v1015_v13 }
 0x2d4   :  { %v1397_v15 = vpop.f32.mrf.mxu1 }
 0x2d5   :  { %v1021_v16 = vmax.f32 %v1016_v14, 0.0 }
 0x2d6   :  { %v1018_v18 = vpop.f32.mrf.mxu1 }
 0x2d7   :  { %v1022_v19 = vpack.c.bf16 %v1021_v16, %v1021_v16 }
 0x2d8   :  { %v1398_v20 = vpop.f32.mrf.mxu1 }
 0x2d9   :  { %1416 = vmatmul.mubr.bf16.vlgmr.msra.gmra.mxu0 %v1022_v19 }
 0x399   :  { %v1128_v17 = vpop.f32.mrf.mxu0 }
 0x39a   :  { %v1129_v22 = vadd.f32 %v1235_v21, %v1128_v17 }
 0x39b   :  { %v1417_v23 = vpop.f32.mrf.mxu0 }
 0x39c   :  { %1134 = vst [vmem:[#allocation11] sm:$0xff] %v1129_v22 }
 0x39d   :  { %v1131_v24 = vpop.f32.mrf.mxu0 }
 0x39e   :  { %1628 = shalt.err (!%p1625_p1)
}
 0x39f   :  { %1144 = dma.vmem_to_hbm [thread:$0]  %s1142_s17, 128, %s1786_s9, [#allocation4]   ;;  %v1418_v25 = vpop.f32.mrf.mxu0 }
 0x3a0   :  { %1643 = dma.done.wait [#allocation4], 128  }
 0x3a1   :  { %1644 = vsyncadd [#allocation4], 4294967168 }
 0x3a2   :  { %1148 = vsyncpa [#allocation3], 1 }
 0x3a3   :  { %1149 = vsyncpa [#allocation6], 1 }
 0x3a4   :  { %1150 = vsyncpa [#allocation9], 1 }
 0x3a5   :  { %1151 = vsyncpa [#allocation4], 1 }

</bundles_post_ra>
